<compile_context>
chip_gen: v5e
topology: v5e:2x2
jax: 0.10.0
libtpu: 0.0.40
codegen_flags: <defaults>
</compile_context>

<pallas_src>
import jax
import jax.numpy as jnp
from jax import lax
from jax.experimental import pallas as pl
from jax.experimental.pallas import tpu as pltpu


def _ceil_mult(n, m):
    return ((n + m - 1) // m) * m


def _padded_vmem_bytes(shape, dtype_bytes=4):
    """Conservative VMEM footprint of an array with (8, 128) tile padding."""
    if len(shape) == 1:
        return _ceil_mult(shape[0], 128) * dtype_bytes
    lead = 1
    for d in shape[:-2]:
        lead *= d
    return lead * _ceil_mult(shape[-2], 8) * _ceil_mult(shape[-1], 128) * dtype_bytes


def lstm_kernel(x_ref, wih_ref, whh_ref, b_ref, wlin_ref, blin_ref,
                y_ref, gx_ref):
    """Single-invocation LSTM forward + linear head.

    x_ref   : (T*Bp, D_in)  time-major rows (t major, padded batch minor)
    wih_ref : (D_in, 4H)    gate-fused W_ih^T   (gate order i, f, g, o)
    whh_ref : (H, 4H)       gate-fused W_hh^T
    b_ref   : (1, 4H)       gate-fused (b_ih + b_hh)
    wlin_ref: (H, O),  blin_ref: (1, O)
    y_ref   : (Bp, O)       padded output (wrapper slices the real batch rows)
    gx_ref  : (T*Bp, 4H)    VMEM scratch: pre-projected input + bias
    """
    TBp, H4 = gx_ref.shape
    Bp = y_ref.shape[0]
    T = TBp // Bp
    H = whh_ref.shape[0]

    # ---- one-time: fused input projection for all timesteps in a single wide
    # matmul, bias folded in, so the serial time loop only does h @ W_hh_all.
    gx_ref[...] = (
        jnp.dot(x_ref[...], wih_ref[...], preferred_element_type=jnp.float32)
        + b_ref[...])

    # loop-invariant fused recurrent weight, hoisted out of the time loop
    whh = whh_ref[...]                               # (H, 4H)

    def step(t, carry):
        h, c = carry
        # sublane-aligned read: Bp is a multiple of 8, so t*Bp is 8-aligned
        row = pl.ds(pl.multiple_of(t * Bp, 8), Bp)
        g_all = gx_ref[row, :] + jnp.dot(h, whh,
                                         preferred_element_type=jnp.float32)
        if H % 128 == 0:
            # gate slices are lane-tile aligned -> free; activate per gate
            i_g = jax.nn.sigmoid(g_all[:, 0 * H:1 * H])
            f_g = jax.nn.sigmoid(g_all[:, 1 * H:2 * H])
            g_g = jnp.tanh(g_all[:, 2 * H:3 * H])
            o_g = jax.nn.sigmoid(g_all[:, 3 * H:4 * H])
        else:
            # H < 128: activate full-width, select tanh lanes with a static mask
            sig = jax.nn.sigmoid(g_all)
            tnh = jnp.tanh(g_all)
            lane = lax.broadcasted_iota(jnp.int32, g_all.shape, 1)
            act = jnp.where((lane >= 2 * H) & (lane < 3 * H), tnh, sig)
            i_g = act[:, 0 * H:1 * H]
            f_g = act[:, 1 * H:2 * H]
            g_g = act[:, 2 * H:3 * H]
            o_g = act[:, 3 * H:4 * H]
        c_new = f_g * c + i_g * g_g
        h_new = o_g * jnp.tanh(c_new)
        return h_new, c_new

    h0 = jnp.zeros((Bp, H), jnp.float32)             # PyTorch default zero init
    c0 = jnp.zeros((Bp, H), jnp.float32)
    unroll = True if T <= 16 else 8                  # shape-aware unrolling
    h_T, _ = lax.fori_loop(0, T, step, (h0, c0), unroll=unroll)

    # linear head on the last hidden state
    y_ref[...] = (jnp.dot(h_T, wlin_ref[...], preferred_element_type=jnp.float32)
                  + blin_ref[...]).astype(y_ref.dtype)


def lstm_forward(x, w_ih, w_hh, b_ih, b_hh, w_lin, b_lin):
    """x: (seq_len, batch, input_dim). Returns flat (batch * output_dim,)."""
    seq_len, batch, input_dim = x.shape
    hidden = w_hh.shape[1]
    output_dim = w_lin.shape[0]
    bp = _ceil_mult(batch, 8)                        # sublane-aligned batch

    # pure layout glue: gate-fused transposes + zero-padded batch
    wih_all = jnp.transpose(w_ih)                    # (D, 4H), gate order i,f,g,o
    whh_all = jnp.transpose(w_hh)                    # (H, 4H)
    bias = (b_ih + b_hh).reshape(1, 4 * hidden)      # (1, 4H)
    wlin_t = jnp.transpose(w_lin)                    # (H, O)
    blin2 = b_lin.reshape(1, output_dim)             # (1, O)

    x_pad = jnp.pad(x, ((0, 0), (0, bp - batch), (0, 0)))
    x2d = x_pad.reshape(seq_len * bp, input_dim)     # (T*Bp, D)

    # VMEM budget: inputs/outputs (x2 for pipeline buffers) + scratch + headroom
    in_out_bytes = sum(_padded_vmem_bytes(s) for s in [
        (seq_len * bp, input_dim), (input_dim, 4 * hidden),
        (hidden, 4 * hidden), (1, 4 * hidden),
        (hidden, output_dim), (1, output_dim), (bp, output_dim)])
    scratch_bytes = _padded_vmem_bytes((seq_len * bp, 4 * hidden))
    vmem_limit = 2 * in_out_bytes + scratch_bytes
    vmem_limit = min(max(int(vmem_limit * 1.5) + (1 << 20), 4 << 20), 64 << 20)

    y = pl.pallas_call(
        lstm_kernel,
        out_shape=jax.ShapeDtypeStruct((bp, output_dim), jnp.float32),
        grid_spec=pltpu.PrefetchScalarGridSpec(
            num_scalar_prefetch=0,
            grid=(1,),   # single invocation: time recurrence runs in-kernel
            in_specs=[
                pl.BlockSpec((seq_len * bp, input_dim), lambda i: (0, 0)),
                pl.BlockSpec((input_dim, 4 * hidden), lambda i: (0, 0)),
                pl.BlockSpec((hidden, 4 * hidden), lambda i: (0, 0)),
                pl.BlockSpec((1, 4 * hidden), lambda i: (0, 0)),
                pl.BlockSpec((hidden, output_dim), lambda i: (0, 0)),
                pl.BlockSpec((1, output_dim), lambda i: (0, 0)),
            ],
            out_specs=pl.BlockSpec((bp, output_dim), lambda i: (0, 0)),
            scratch_shapes=[
                pltpu.VMEM((seq_len * bp, 4 * hidden), jnp.float32),
            ],
        ),
        compiler_params=pltpu.CompilerParams(
            dimension_semantics=("arbitrary",),
            vmem_limit_bytes=vmem_limit),
    )(x2d, wih_all, whh_all, bias, wlin_t, blin2)

    return y[:batch, :].reshape(-1)                  # y_pred.view(-1)


def lstm_reference(x, w_ih, w_hh, b_ih, b_hh, w_lin, b_lin):
    """Pure-JAX reference of the same forward (for validation)."""
    seq_len, batch, _ = x.shape
    hidden = w_hh.shape[1]
    h = jnp.zeros((batch, hidden), jnp.float32)
    c = jnp.zeros((batch, hidden), jnp.float32)
    for t in range(seq_len):
        gates = x[t] @ w_ih.T + h @ w_hh.T + b_ih + b_hh
        i = jax.nn.sigmoid(gates[:, 0 * hidden:1 * hidden])
        f = jax.nn.sigmoid(gates[:, 1 * hidden:2 * hidden])
        g = jnp.tanh(gates[:, 2 * hidden:3 * hidden])
        o = jax.nn.sigmoid(gates[:, 3 * hidden:4 * hidden])
        c = f * c + i * g
        h = o * jnp.tanh(c)
    return (h @ w_lin.T + b_lin).reshape(-1)


if __name__ == "__main__":
    # small shapes consistent with the module's forward
    seq_len, batch, input_dim, hidden, output_dim = 8, 2, 16, 32, 3

    key = jax.random.PRNGKey(0)
    ks = jax.random.split(key, 7)
    scale = 1.0 / jnp.sqrt(hidden)
    x = jax.random.normal(ks[0], (seq_len, batch, input_dim), jnp.float32)
    w_ih = jax.random.uniform(ks[1], (4 * hidden, input_dim), jnp.float32,
                              -scale, scale)
    w_hh = jax.random.uniform(ks[2], (4 * hidden, hidden), jnp.float32,
                              -scale, scale)
    b_ih = jax.random.uniform(ks[3], (4 * hidden,), jnp.float32, -scale, scale)
    b_hh = jax.random.uniform(ks[4], (4 * hidden,), jnp.float32, -scale, scale)
    w_lin = jax.random.uniform(ks[5], (output_dim, hidden), jnp.float32,
                               -scale, scale)
    b_lin = jax.random.uniform(ks[6], (output_dim,), jnp.float32, -scale, scale)

    y = lstm_forward(x, w_ih, w_hh, b_ih, b_hh, w_lin, b_lin)
    jax.block_until_ready(y)

    y_ref = lstm_reference(x, w_ih, w_hh, b_ih, b_hh, w_lin, b_lin)
    assert y.shape == (batch * output_dim,)
    assert jnp.allclose(y, y_ref, atol=1e-4, rtol=1e-4)

    print("KERNEL_OK")
</pallas_src>

<mosaic_0001>
module attributes {stable_mosaic.version = 11 : i64} {
  func.func @lstm_kernel(%arg0: i32, %arg1: memref<64x16xf32, #tpu.memory_space<vmem>>, %arg2: memref<16x128xf32, #tpu.memory_space<vmem>>, %arg3: memref<32x128xf32, #tpu.memory_space<vmem>>, %arg4: memref<1x128xf32, #tpu.memory_space<vmem>>, %arg5: memref<32x3xf32, #tpu.memory_space<vmem>>, %arg6: memref<1x3xf32, #tpu.memory_space<vmem>>, %arg7: memref<8x3xf32, #tpu.memory_space<vmem>>, %arg8: memref<64x128xf32, #tpu.memory_space<vmem>>) attributes {dimension_semantics = [#tpu.dimension_semantics<arbitrary>], iteration_bounds = array<i64: 1>, scalar_prefetch = 0 : i64, scratch_operands = 1 : i64, tpu.core_type = #tpu.core_type<tc>, window_params = [{pipeline_mode = #tpu.pipeline_mode<synchronous>, transform_indices = @transform_0, window_bounds = array<i64: 64, 16>}, {pipeline_mode = #tpu.pipeline_mode<synchronous>, transform_indices = @transform_1, window_bounds = array<i64: 16, 128>}, {pipeline_mode = #tpu.pipeline_mode<synchronous>, transform_indices = @transform_2, window_bounds = array<i64: 32, 128>}, {pipeline_mode = #tpu.pipeline_mode<synchronous>, transform_indices = @transform_3, window_bounds = array<i64: 1, 128>}, {pipeline_mode = #tpu.pipeline_mode<synchronous>, transform_indices = @transform_4, window_bounds = array<i64: 32, 3>}, {pipeline_mode = #tpu.pipeline_mode<synchronous>, transform_indices = @transform_5, window_bounds = array<i64: 1, 3>}, {pipeline_mode = #tpu.pipeline_mode<synchronous>, transform_indices = @transform_6, window_bounds = array<i64: 8, 3>}]} {
    %c0 = arith.constant 0 : index
    %c0_0 = arith.constant 0 : index
    %0 = vector.load %arg1[%c0, %c0_0] : memref<64x16xf32, #tpu.memory_space<vmem>>, vector<64x16xf32>
    %c0_1 = arith.constant 0 : index
    %c0_2 = arith.constant 0 : index
    %1 = vector.load %arg2[%c0_1, %c0_2] : memref<16x128xf32, #tpu.memory_space<vmem>>, vector<16x128xf32>
    %cst = arith.constant dense<0.000000e+00> : vector<64x128xf32>
    %2 = tpu.matmul %0, %1, %cst {dimension_numbers = #tpu.dot_dimension_numbers<[1], [0], [0], [1], [0, 0, 1, 1], [], []>} : vector<64x16xf32>, vector<16x128xf32>, vector<64x128xf32> -> vector<64x128xf32>
    %c0_3 = arith.constant 0 : index
    %c0_4 = arith.constant 0 : index
    %3 = vector.load %arg4[%c0_3, %c0_4] : memref<1x128xf32, #tpu.memory_space<vmem>>, vector<1x128xf32>
    %4 = vector.broadcast %3 : vector<1x128xf32> to vector<64x128xf32>
    %5 = arith.addf %2, %4 : vector<64x128xf32>
    %c0_5 = arith.constant 0 : index
    %c0_6 = arith.constant 0 : index
    %6 = vector.load %arg8[%c0_5, %c0_6] : memref<64x128xf32, #tpu.memory_space<vmem>>, vector<64x128xf32>
    tpu.vector_store %arg8[%c0_5, %c0_6], %5 {strides = array<i32>} : memref<64x128xf32, #tpu.memory_space<vmem>>, vector<64x128xf32>,
    %c0_7 = arith.constant 0 : index
    %c0_8 = arith.constant 0 : index
    %7 = vector.load %arg3[%c0_7, %c0_8] : memref<32x128xf32, #tpu.memory_space<vmem>>, vector<32x128xf32>
    %cst_9 = arith.constant 0.000000e+00 : f32
    %8 = vector.broadcast %cst_9 : f32 to vector<8x32xf32>
    %cst_10 = arith.constant 0.000000e+00 : f32
    %9 = vector.broadcast %cst_10 : f32 to vector<8x32xf32>
    %c0_i32 = arith.constant 0 : i32
    %c8_i32 = arith.constant 8 : i32
    %10 = arith.muli %c0_i32, %c8_i32 : i32
    %11 = tpu.assume_multiple %10, 8 : i32
    %12 = arith.index_cast %11 : i32 to index
    %c0_11 = arith.constant 0 : index
    %13 = vector.load %arg8[%12, %c0_11] : memref<64x128xf32, #tpu.memory_space<vmem>>, vector<8x128xf32>
    %cst_12 = arith.constant dense<0.000000e+00> : vector<8x128xf32>
    %14 = tpu.matmul %8, %7, %cst_12 {dimension_numbers = #tpu.dot_dimension_numbers<[1], [0], [0], [1], [0, 0, 1, 1], [], []>} : vector<8x32xf32>, vector<32x128xf32>, vector<8x128xf32> -> vector<8x128xf32>
    %15 = arith.addf %13, %14 : vector<8x128xf32>
    %16 = arith.negf %15 : vector<8x128xf32>
    %17 = math.exp %16 : vector<8x128xf32>
    %cst_13 = arith.constant 1.000000e+00 : f32
    %18 = vector.broadcast %cst_13 : f32 to vector<8x128xf32>
    %19 = arith.addf %18, %17 : vector<8x128xf32>
    %20 = arith.divf %18, %19 : vector<8x128xf32>
    %21 = math.tanh %15 : vector<8x128xf32>
    %22 = tpu.iota {dimensions = array<i32: 1>} : vector<8x128xi32>
    %c64_i32 = arith.constant 64 : i32
    %23 = vector.broadcast %c64_i32 : i32 to vector<8x128xi32>
    %24 = arith.cmpi sge, %22, %23 : vector<8x128xi32>
    %c96_i32 = arith.constant 96 : i32
    %25 = vector.broadcast %c96_i32 : i32 to vector<8x128xi32>
    %26 = arith.cmpi slt, %22, %25 : vector<8x128xi32>
    %27 = arith.andi %24, %26 : vector<8x128xi1>
    %28 = arith.select %27, %21, %20 : vector<8x128xi1>, vector<8x128xf32>
    %29 = vector.extract_strided_slice %28 {offsets = [0, 0], sizes = [8, 32], strides = [1, 1]} : vector<8x128xf32> to vector<8x32xf32>
    %30 = vector.extract_strided_slice %28 {offsets = [0, 32], sizes = [8, 32], strides = [1, 1]} : vector<8x128xf32> to vector<8x32xf32>
    %31 = vector.extract_strided_slice %28 {offsets = [0, 64], sizes = [8, 32], strides = [1, 1]} : vector<8x128xf32> to vector<8x32xf32>
    %32 = vector.extract_strided_slice %28 {offsets = [0, 96], sizes = [8, 32], strides = [1, 1]} : vector<8x128xf32> to vector<8x32xf32>
    %33 = arith.mulf %30, %9 : vector<8x32xf32>
    %34 = arith.mulf %29, %31 : vector<8x32xf32>
    %35 = arith.addf %33, %34 : vector<8x32xf32>
    %36 = math.tanh %35 : vector<8x32xf32>
    %37 = arith.mulf %32, %36 : vector<8x32xf32>
    %c1_i32 = arith.constant 1 : i32
    %c8_i32_14 = arith.constant 8 : i32
    %38 = arith.muli %c1_i32, %c8_i32_14 : i32
    %39 = tpu.assume_multiple %38, 8 : i32
    %40 = arith.index_cast %39 : i32 to index
    %c0_15 = arith.constant 0 : index
    %41 = vector.load %arg8[%40, %c0_15] : memref<64x128xf32, #tpu.memory_space<vmem>>, vector<8x128xf32>
    %cst_16 = arith.constant dense<0.000000e+00> : vector<8x128xf32>
    %42 = tpu.matmul %37, %7, %cst_16 {dimension_numbers = #tpu.dot_dimension_numbers<[1], [0], [0], [1], [0, 0, 1, 1], [], []>} : vector<8x32xf32>, vector<32x128xf32>, vector<8x128xf32> -> vector<8x128xf32>
    %43 = arith.addf %41, %42 : vector<8x128xf32>
    %44 = arith.negf %43 : vector<8x128xf32>
    %45 = math.exp %44 : vector<8x128xf32>
    %cst_17 = arith.constant 1.000000e+00 : f32
    %46 = vector.broadcast %cst_17 : f32 to vector<8x128xf32>
    %47 = arith.addf %46, %45 : vector<8x128xf32>
    %48 = arith.divf %46, %47 : vector<8x128xf32>
    %49 = math.tanh %43 : vector<8x128xf32>
    %50 = tpu.iota {dimensions = array<i32: 1>} : vector<8x128xi32>
    %c64_i32_18 = arith.constant 64 : i32
    %51 = vector.broadcast %c64_i32_18 : i32 to vector<8x128xi32>
    %52 = arith.cmpi sge, %50, %51 : vector<8x128xi32>
    %c96_i32_19 = arith.constant 96 : i32
    %53 = vector.broadcast %c96_i32_19 : i32 to vector<8x128xi32>
    %54 = arith.cmpi slt, %50, %53 : vector<8x128xi32>
    %55 = arith.andi %52, %54 : vector<8x128xi1>
    %56 = arith.select %55, %49, %48 : vector<8x128xi1>, vector<8x128xf32>
    %57 = vector.extract_strided_slice %56 {offsets = [0, 0], sizes = [8, 32], strides = [1, 1]} : vector<8x128xf32> to vector<8x32xf32>
    %58 = vector.extract_strided_slice %56 {offsets = [0, 32], sizes = [8, 32], strides = [1, 1]} : vector<8x128xf32> to vector<8x32xf32>
    %59 = vector.extract_strided_slice %56 {offsets = [0, 64], sizes = [8, 32], strides = [1, 1]} : vector<8x128xf32> to vector<8x32xf32>
    %60 = vector.extract_strided_slice %56 {offsets = [0, 96], sizes = [8, 32], strides = [1, 1]} : vector<8x128xf32> to vector<8x32xf32>
    %61 = arith.mulf %58, %35 : vector<8x32xf32>
    %62 = arith.mulf %57, %59 : vector<8x32xf32>
    %63 = arith.addf %61, %62 : vector<8x32xf32>
    %64 = math.tanh %63 : vector<8x32xf32>
    %65 = arith.mulf %60, %64 : vector<8x32xf32>
    %c2_i32 = arith.constant 2 : i32
    %c8_i32_20 = arith.constant 8 : i32
    %66 = arith.muli %c2_i32, %c8_i32_20 : i32
    %67 = tpu.assume_multiple %66, 8 : i32
    %68 = arith.index_cast %67 : i32 to index
    %c0_21 = arith.constant 0 : index
    %69 = vector.load %arg8[%68, %c0_21] : memref<64x128xf32, #tpu.memory_space<vmem>>, vector<8x128xf32>
    %cst_22 = arith.constant dense<0.000000e+00> : vector<8x128xf32>
    %70 = tpu.matmul %65, %7, %cst_22 {dimension_numbers = #tpu.dot_dimension_numbers<[1], [0], [0], [1], [0, 0, 1, 1], [], []>} : vector<8x32xf32>, vector<32x128xf32>, vector<8x128xf32> -> vector<8x128xf32>
    %71 = arith.addf %69, %70 : vector<8x128xf32>
    %72 = arith.negf %71 : vector<8x128xf32>
    %73 = math.exp %72 : vector<8x128xf32>
    %cst_23 = arith.constant 1.000000e+00 : f32
    %74 = vector.broadcast %cst_23 : f32 to vector<8x128xf32>
    %75 = arith.addf %74, %73 : vector<8x128xf32>
    %76 = arith.divf %74, %75 : vector<8x128xf32>
    %77 = math.tanh %71 : vector<8x128xf32>
    %78 = tpu.iota {dimensions = array<i32: 1>} : vector<8x128xi32>
    %c64_i32_24 = arith.constant 64 : i32
    %79 = vector.broadcast %c64_i32_24 : i32 to vector<8x128xi32>
    %80 = arith.cmpi sge, %78, %79 : vector<8x128xi32>
    %c96_i32_25 = arith.constant 96 : i32
    %81 = vector.broadcast %c96_i32_25 : i32 to vector<8x128xi32>
    %82 = arith.cmpi slt, %78, %81 : vector<8x128xi32>
    %83 = arith.andi %80, %82 : vector<8x128xi1>
    %84 = arith.select %83, %77, %76 : vector<8x128xi1>, vector<8x128xf32>
    %85 = vector.extract_strided_slice %84 {offsets = [0, 0], sizes = [8, 32], strides = [1, 1]} : vector<8x128xf32> to vector<8x32xf32>
    %86 = vector.extract_strided_slice %84 {offsets = [0, 32], sizes = [8, 32], strides = [1, 1]} : vector<8x128xf32> to vector<8x32xf32>
    %87 = vector.extract_strided_slice %84 {offsets = [0, 64], sizes = [8, 32], strides = [1, 1]} : vector<8x128xf32> to vector<8x32xf32>
    %88 = vector.extract_strided_slice %84 {offsets = [0, 96], sizes = [8, 32], strides = [1, 1]} : vector<8x128xf32> to vector<8x32xf32>
    %89 = arith.mulf %86, %63 : vector<8x32xf32>
    %90 = arith.mulf %85, %87 : vector<8x32xf32>
    %91 = arith.addf %89, %90 : vector<8x32xf32>
    %92 = math.tanh %91 : vector<8x32xf32>
    %93 = arith.mulf %88, %92 : vector<8x32xf32>
    %c3_i32 = arith.constant 3 : i32
    %c8_i32_26 = arith.constant 8 : i32
    %94 = arith.muli %c3_i32, %c8_i32_26 : i32
    %95 = tpu.assume_multiple %94, 8 : i32
    %96 = arith.index_cast %95 : i32 to index
    %c0_27 = arith.constant 0 : index
    %97 = vector.load %arg8[%96, %c0_27] : memref<64x128xf32, #tpu.memory_space<vmem>>, vector<8x128xf32>
    %cst_28 = arith.constant dense<0.000000e+00> : vector<8x128xf32>
    %98 = tpu.matmul %93, %7, %cst_28 {dimension_numbers = #tpu.dot_dimension_numbers<[1], [0], [0], [1], [0, 0, 1, 1], [], []>} : vector<8x32xf32>, vector<32x128xf32>, vector<8x128xf32> -> vector<8x128xf32>
    %99 = arith.addf %97, %98 : vector<8x128xf32>
    %100 = arith.negf %99 : vector<8x128xf32>
    %101 = math.exp %100 : vector<8x128xf32>
    %cst_29 = arith.constant 1.000000e+00 : f32
    %102 = vector.broadcast %cst_29 : f32 to vector<8x128xf32>
    %103 = arith.addf %102, %101 : vector<8x128xf32>
    %104 = arith.divf %102, %103 : vector<8x128xf32>
    %105 = math.tanh %99 : vector<8x128xf32>
    %106 = tpu.iota {dimensions = array<i32: 1>} : vector<8x128xi32>
    %c64_i32_30 = arith.constant 64 : i32
    %107 = vector.broadcast %c64_i32_30 : i32 to vector<8x128xi32>
    %108 = arith.cmpi sge, %106, %107 : vector<8x128xi32>
    %c96_i32_31 = arith.constant 96 : i32
    %109 = vector.broadcast %c96_i32_31 : i32 to vector<8x128xi32>
    %110 = arith.cmpi slt, %106, %109 : vector<8x128xi32>
    %111 = arith.andi %108, %110 : vector<8x128xi1>
    %112 = arith.select %111, %105, %104 : vector<8x128xi1>, vector<8x128xf32>
    %113 = vector.extract_strided_slice %112 {offsets = [0, 0], sizes = [8, 32], strides = [1, 1]} : vector<8x128xf32> to vector<8x32xf32>
    %114 = vector.extract_strided_slice %112 {offsets = [0, 32], sizes = [8, 32], strides = [1, 1]} : vector<8x128xf32> to vector<8x32xf32>
    %115 = vector.extract_strided_slice %112 {offsets = [0, 64], sizes = [8, 32], strides = [1, 1]} : vector<8x128xf32> to vector<8x32xf32>
    %116 = vector.extract_strided_slice %112 {offsets = [0, 96], sizes = [8, 32], strides = [1, 1]} : vector<8x128xf32> to vector<8x32xf32>
    %117 = arith.mulf %114, %91 : vector<8x32xf32>
    %118 = arith.mulf %113, %115 : vector<8x32xf32>
    %119 = arith.addf %117, %118 : vector<8x32xf32>
    %120 = math.tanh %119 : vector<8x32xf32>
    %121 = arith.mulf %116, %120 : vector<8x32xf32>
    %c4_i32 = arith.constant 4 : i32
    %c8_i32_32 = arith.constant 8 : i32
    %122 = arith.muli %c4_i32, %c8_i32_32 : i32
    %123 = tpu.assume_multiple %122, 8 : i32
    %124 = arith.index_cast %123 : i32 to index
    %c0_33 = arith.constant 0 : index
    %125 = vector.load %arg8[%124, %c0_33] : memref<64x128xf32, #tpu.memory_space<vmem>>, vector<8x128xf32>
    %cst_34 = arith.constant dense<0.000000e+00> : vector<8x128xf32>
    %126 = tpu.matmul %121, %7, %cst_34 {dimension_numbers = #tpu.dot_dimension_numbers<[1], [0], [0], [1], [0, 0, 1, 1], [], []>} : vector<8x32xf32>, vector<32x128xf32>, vector<8x128xf32> -> vector<8x128xf32>
    %127 = arith.addf %125, %126 : vector<8x128xf32>
    %128 = arith.negf %127 : vector<8x128xf32>
    %129 = math.exp %128 : vector<8x128xf32>
    %cst_35 = arith.constant 1.000000e+00 : f32
    %130 = vector.broadcast %cst_35 : f32 to vector<8x128xf32>
    %131 = arith.addf %130, %129 : vector<8x128xf32>
    %132 = arith.divf %130, %131 : vector<8x128xf32>
    %133 = math.tanh %127 : vector<8x128xf32>
    %134 = tpu.iota {dimensions = array<i32: 1>} : vector<8x128xi32>
    %c64_i32_36 = arith.constant 64 : i32
    %135 = vector.broadcast %c64_i32_36 : i32 to vector<8x128xi32>
    %136 = arith.cmpi sge, %134, %135 : vector<8x128xi32>
    %c96_i32_37 = arith.constant 96 : i32
    %137 = vector.broadcast %c96_i32_37 : i32 to vector<8x128xi32>
    %138 = arith.cmpi slt, %134, %137 : vector<8x128xi32>
    %139 = arith.andi %136, %138 : vector<8x128xi1>
    %140 = arith.select %139, %133, %132 : vector<8x128xi1>, vector<8x128xf32>
    %141 = vector.extract_strided_slice %140 {offsets = [0, 0], sizes = [8, 32], strides = [1, 1]} : vector<8x128xf32> to vector<8x32xf32>
    %142 = vector.extract_strided_slice %140 {offsets = [0, 32], sizes = [8, 32], strides = [1, 1]} : vector<8x128xf32> to vector<8x32xf32>
    %143 = vector.extract_strided_slice %140 {offsets = [0, 64], sizes = [8, 32], strides = [1, 1]} : vector<8x128xf32> to vector<8x32xf32>
    %144 = vector.extract_strided_slice %140 {offsets = [0, 96], sizes = [8, 32], strides = [1, 1]} : vector<8x128xf32> to vector<8x32xf32>
    %145 = arith.mulf %142, %119 : vector<8x32xf32>
    %146 = arith.mulf %141, %143 : vector<8x32xf32>
    %147 = arith.addf %145, %146 : vector<8x32xf32>
    %148 = math.tanh %147 : vector<8x32xf32>
    %149 = arith.mulf %144, %148 : vector<8x32xf32>
    %c5_i32 = arith.constant 5 : i32
    %c8_i32_38 = arith.constant 8 : i32
    %150 = arith.muli %c5_i32, %c8_i32_38 : i32
    %151 = tpu.assume_multiple %150, 8 : i32
    %152 = arith.index_cast %151 : i32 to index
    %c0_39 = arith.constant 0 : index
    %153 = vector.load %arg8[%152, %c0_39] : memref<64x128xf32, #tpu.memory_space<vmem>>, vector<8x128xf32>
    %cst_40 = arith.constant dense<0.000000e+00> : vector<8x128xf32>
    %154 = tpu.matmul %149, %7, %cst_40 {dimension_numbers = #tpu.dot_dimension_numbers<[1], [0], [0], [1], [0, 0, 1, 1], [], []>} : vector<8x32xf32>, vector<32x128xf32>, vector<8x128xf32> -> vector<8x128xf32>
    %155 = arith.addf %153, %154 : vector<8x128xf32>
    %156 = arith.negf %155 : vector<8x128xf32>
    %157 = math.exp %156 : vector<8x128xf32>
    %cst_41 = arith.constant 1.000000e+00 : f32
    %158 = vector.broadcast %cst_41 : f32 to vector<8x128xf32>
    %159 = arith.addf %158, %157 : vector<8x128xf32>
    %160 = arith.divf %158, %159 : vector<8x128xf32>
    %161 = math.tanh %155 : vector<8x128xf32>
    %162 = tpu.iota {dimensions = array<i32: 1>} : vector<8x128xi32>
    %c64_i32_42 = arith.constant 64 : i32
    %163 = vector.broadcast %c64_i32_42 : i32 to vector<8x128xi32>
    %164 = arith.cmpi sge, %162, %163 : vector<8x128xi32>
    %c96_i32_43 = arith.constant 96 : i32
    %165 = vector.broadcast %c96_i32_43 : i32 to vector<8x128xi32>
    %166 = arith.cmpi slt, %162, %165 : vector<8x128xi32>
    %167 = arith.andi %164, %166 : vector<8x128xi1>
    %168 = arith.select %167, %161, %160 : vector<8x128xi1>, vector<8x128xf32>
    %169 = vector.extract_strided_slice %168 {offsets = [0, 0], sizes = [8, 32], strides = [1, 1]} : vector<8x128xf32> to vector<8x32xf32>
    %170 = vector.extract_strided_slice %168 {offsets = [0, 32], sizes = [8, 32], strides = [1, 1]} : vector<8x128xf32> to vector<8x32xf32>
    %171 = vector.extract_strided_slice %168 {offsets = [0, 64], sizes = [8, 32], strides = [1, 1]} : vector<8x128xf32> to vector<8x32xf32>
    %172 = vector.extract_strided_slice %168 {offsets = [0, 96], sizes = [8, 32], strides = [1, 1]} : vector<8x128xf32> to vector<8x32xf32>
    %173 = arith.mulf %170, %147 : vector<8x32xf32>
    %174 = arith.mulf %169, %171 : vector<8x32xf32>
    %175 = arith.addf %173, %174 : vector<8x32xf32>
    %176 = math.tanh %175 : vector<8x32xf32>
    %177 = arith.mulf %172, %176 : vector<8x32xf32>
    %c6_i32 = arith.constant 6 : i32
    %c8_i32_44 = arith.constant 8 : i32
    %178 = arith.muli %c6_i32, %c8_i32_44 : i32
    %179 = tpu.assume_multiple %178, 8 : i32
    %180 = arith.index_cast %179 : i32 to index
    %c0_45 = arith.constant 0 : index
    %181 = vector.load %arg8[%180, %c0_45] : memref<64x128xf32, #tpu.memory_space<vmem>>, vector<8x128xf32>
    %cst_46 = arith.constant dense<0.000000e+00> : vector<8x128xf32>
    %182 = tpu.matmul %177, %7, %cst_46 {dimension_numbers = #tpu.dot_dimension_numbers<[1], [0], [0], [1], [0, 0, 1, 1], [], []>} : vector<8x32xf32>, vector<32x128xf32>, vector<8x128xf32> -> vector<8x128xf32>
    %183 = arith.addf %181, %182 : vector<8x128xf32>
    %184 = arith.negf %183 : vector<8x128xf32>
    %185 = math.exp %184 : vector<8x128xf32>
    %cst_47 = arith.constant 1.000000e+00 : f32
    %186 = vector.broadcast %cst_47 : f32 to vector<8x128xf32>
    %187 = arith.addf %186, %185 : vector<8x128xf32>
    %188 = arith.divf %186, %187 : vector<8x128xf32>
    %189 = math.tanh %183 : vector<8x128xf32>
    %190 = tpu.iota {dimensions = array<i32: 1>} : vector<8x128xi32>
    %c64_i32_48 = arith.constant 64 : i32
    %191 = vector.broadcast %c64_i32_48 : i32 to vector<8x128xi32>
    %192 = arith.cmpi sge, %190, %191 : vector<8x128xi32>
    %c96_i32_49 = arith.constant 96 : i32
    %193 = vector.broadcast %c96_i32_49 : i32 to vector<8x128xi32>
    %194 = arith.cmpi slt, %190, %193 : vector<8x128xi32>
    %195 = arith.andi %192, %194 : vector<8x128xi1>
    %196 = arith.select %195, %189, %188 : vector<8x128xi1>, vector<8x128xf32>
    %197 = vector.extract_strided_slice %196 {offsets = [0, 0], sizes = [8, 32], strides = [1, 1]} : vector<8x128xf32> to vector<8x32xf32>
    %198 = vector.extract_strided_slice %196 {offsets = [0, 32], sizes = [8, 32], strides = [1, 1]} : vector<8x128xf32> to vector<8x32xf32>
    %199 = vector.extract_strided_slice %196 {offsets = [0, 64], sizes = [8, 32], strides = [1, 1]} : vector<8x128xf32> to vector<8x32xf32>
    %200 = vector.extract_strided_slice %196 {offsets = [0, 96], sizes = [8, 32], strides = [1, 1]} : vector<8x128xf32> to vector<8x32xf32>
    %201 = arith.mulf %198, %175 : vector<8x32xf32>
    %202 = arith.mulf %197, %199 : vector<8x32xf32>
    %203 = arith.addf %201, %202 : vector<8x32xf32>
    %204 = math.tanh %203 : vector<8x32xf32>
    %205 = arith.mulf %200, %204 : vector<8x32xf32>
    %c7_i32 = arith.constant 7 : i32
    %c8_i32_50 = arith.constant 8 : i32
    %206 = arith.muli %c7_i32, %c8_i32_50 : i32
    %207 = tpu.assume_multiple %206, 8 : i32
    %208 = arith.index_cast %207 : i32 to index
    %c0_51 = arith.constant 0 : index
    %209 = vector.load %arg8[%208, %c0_51] : memref<64x128xf32, #tpu.memory_space<vmem>>, vector<8x128xf32>
    %cst_52 = arith.constant dense<0.000000e+00> : vector<8x128xf32>
    %210 = tpu.matmul %205, %7, %cst_52 {dimension_numbers = #tpu.dot_dimension_numbers<[1], [0], [0], [1], [0, 0, 1, 1], [], []>} : vector<8x32xf32>, vector<32x128xf32>, vector<8x128xf32> -> vector<8x128xf32>
    %211 = arith.addf %209, %210 : vector<8x128xf32>
    %212 = arith.negf %211 : vector<8x128xf32>
    %213 = math.exp %212 : vector<8x128xf32>
    %cst_53 = arith.constant 1.000000e+00 : f32
    %214 = vector.broadcast %cst_53 : f32 to vector<8x128xf32>
    %215 = arith.addf %214, %213 : vector<8x128xf32>
    %216 = arith.divf %214, %215 : vector<8x128xf32>
    %217 = math.tanh %211 : vector<8x128xf32>
    %218 = tpu.iota {dimensions = array<i32: 1>} : vector<8x128xi32>
    %c64_i32_54 = arith.constant 64 : i32
    %219 = vector.broadcast %c64_i32_54 : i32 to vector<8x128xi32>
    %220 = arith.cmpi sge, %218, %219 : vector<8x128xi32>
    %c96_i32_55 = arith.constant 96 : i32
    %221 = vector.broadcast %c96_i32_55 : i32 to vector<8x128xi32>
    %222 = arith.cmpi slt, %218, %221 : vector<8x128xi32>
    %223 = arith.andi %220, %222 : vector<8x128xi1>
    %224 = arith.select %223, %217, %216 : vector<8x128xi1>, vector<8x128xf32>
    %225 = vector.extract_strided_slice %224 {offsets = [0, 0], sizes = [8, 32], strides = [1, 1]} : vector<8x128xf32> to vector<8x32xf32>
    %226 = vector.extract_strided_slice %224 {offsets = [0, 32], sizes = [8, 32], strides = [1, 1]} : vector<8x128xf32> to vector<8x32xf32>
    %227 = vector.extract_strided_slice %224 {offsets = [0, 64], sizes = [8, 32], strides = [1, 1]} : vector<8x128xf32> to vector<8x32xf32>
    %228 = vector.extract_strided_slice %224 {offsets = [0, 96], sizes = [8, 32], strides = [1, 1]} : vector<8x128xf32> to vector<8x32xf32>
    %229 = arith.mulf %226, %203 : vector<8x32xf32>
    %230 = arith.mulf %225, %227 : vector<8x32xf32>
    %231 = arith.addf %229, %230 : vector<8x32xf32>
    %232 = math.tanh %231 : vector<8x32xf32>
    %233 = arith.mulf %228, %232 : vector<8x32xf32>
    %c8_i32_56 = arith.constant 8 : i32
    %c0_57 = arith.constant 0 : index
    %c0_58 = arith.constant 0 : index
    %234 = vector.load %arg5[%c0_57, %c0_58] : memref<32x3xf32, #tpu.memory_space<vmem>>, vector<32x3xf32>
    %cst_59 = arith.constant dense<0.000000e+00> : vector<8x3xf32>
    %235 = tpu.matmul %233, %234, %cst_59 {dimension_numbers = #tpu.dot_dimension_numbers<[1], [0], [0], [1], [0, 0, 1, 1], [], []>} : vector<8x32xf32>, vector<32x3xf32>, vector<8x3xf32> -> vector<8x3xf32>
    %c0_60 = arith.constant 0 : index
    %c0_61 = arith.constant 0 : index
    %236 = vector.load %arg6[%c0_60, %c0_61] : memref<1x3xf32, #tpu.memory_space<vmem>>, vector<1x3xf32>
    %237 = vector.broadcast %236 : vector<1x3xf32> to vector<8x3xf32>
    %238 = arith.addf %235, %237 : vector<8x3xf32>
    %c0_62 = arith.constant 0 : index
    %c0_63 = arith.constant 0 : index
    %239 = vector.load %arg7[%c0_62, %c0_63] : memref<8x3xf32, #tpu.memory_space<vmem>>, vector<8x3xf32>
    tpu.vector_store %arg7[%c0_62, %c0_63], %238 {strides = array<i32>} : memref<8x3xf32, #tpu.memory_space<vmem>>, vector<8x3xf32>,
    return
  }
  func.func @transform_0(%arg0: i32) -> (i32, i32) {
    %c0_i32 = arith.constant 0 : i32
    %c0_i32_0 = arith.constant 0 : i32
    %c0_i32_1 = arith.constant 0 : i32
    return %c0_i32, %c0_i32_0 : i32, i32
  }
  func.func @transform_1(%arg0: i32) -> (i32, i32) {
    %c0_i32 = arith.constant 0 : i32
    %c0_i32_0 = arith.constant 0 : i32
    %c0_i32_1 = arith.constant 0 : i32
    return %c0_i32, %c0_i32_0 : i32, i32
  }
  func.func @transform_2(%arg0: i32) -> (i32, i32) {
    %c0_i32 = arith.constant 0 : i32
    %c0_i32_0 = arith.constant 0 : i32
    %c0_i32_1 = arith.constant 0 : i32
    return %c0_i32, %c0_i32_0 : i32, i32
  }
  func.func @transform_3(%arg0: i32) -> (i32, i32) {
    %c0_i32 = arith.constant 0 : i32
    %c0_i32_0 = arith.constant 0 : i32
    %c0_i32_1 = arith.constant 0 : i32
    return %c0_i32, %c0_i32_0 : i32, i32
  }
  func.func @transform_4(%arg0: i32) -> (i32, i32) {
    %c0_i32 = arith.constant 0 : i32
    %c0_i32_0 = arith.constant 0 : i32
    %c0_i32_1 = arith.constant 0 : i32
    return %c0_i32, %c0_i32_0 : i32, i32
  }
  func.func @transform_5(%arg0: i32) -> (i32, i32) {
    %c0_i32 = arith.constant 0 : i32
    %c0_i32_0 = arith.constant 0 : i32
    %c0_i32_1 = arith.constant 0 : i32
    return %c0_i32, %c0_i32_0 : i32, i32
  }
  func.func @transform_6(%arg0: i32) -> (i32, i32) {
    %c0_i32 = arith.constant 0 : i32
    %c0_i32_0 = arith.constant 0 : i32
    %c0_i32_1 = arith.constant 0 : i32
    return %c0_i32, %c0_i32_0 : i32, i32
  }
}

</mosaic_0001>

<bundles_post_ra>
// kernel: tpu_custom_call.1
= control target key start
LH: loop header
LB: loop body
LE: loop exit
PB: predicated region body
PF: predicated region fallthrough
CT: control target
= control target key end

     0   :  { %vm37_vm0 = vcmask 130048   ;;  %v782_v8 = vmov 0.0   ;;  %v161_v18 = vlaneseq  ;;  %s784_s13 = smov 32   ;;  %vm116_vm8 = vcmask 261120   ;;  %s1010_s1 = inlined_call_operand.vmem [shape: f32[16,128], index: 1, kind: input, shape index: {}]   ;;  %s1011_s0 = inlined_call_operand.vmem [shape: f32[64,16], index: 0, kind: input, shape index: {}]   ;;  %s1012_s2 = inlined_call_operand.vmem [shape: f32[32,128], index: 2, kind: input, shape index: {}]   ;;  %s1013_s3 = inlined_call_operand.vmem [shape: f32[1,128], index: 3, kind: input, shape index: {}]   ;;  %s1014_s4 = inlined_call_operand.vmem [shape: f32[32,3], index: 4, kind: input, shape index: {}]   ;;  %s1015_s5 = inlined_call_operand.vmem [shape: f32[1,3], index: 5, kind: input, shape index: {}]   ;;  %s1016_s6 = inlined_call_operand.vmem [shape: f32[8,3], index: 6, kind: output, shape index: {}]  }
   0x1   :  { %v32_v0 = vld [vmem:[%s1010_s1 + $0x8] sm:$0xff]  ;;  %v31_v1 = vld [vmem:[%s1010_s1] sm:$0xff]  ;;  %v832_v3 = vld [vmem:[%s1012_s2 + $0x18] sm:$0xff] }
   0x2   :  { %709 = vmatpush.msra.mxu1 %v32_v0  ;;  %v28_v2 = vld [vmem:[%s1011_s0 + $0x28] sm:$0xff]  ;;  %76 = vmatpush.msra.mxu0 %v32_v0  ;;  %v23_v4 = vld [vmem:[%s1011_s0] sm:$0xff]  ;;  %v842_v5 = vld [vmem:[%s1012_s2 + $0x10] sm:$0xff]  ;;  %v162_v20 = vand.u32 127, %v161_v18 }
   0x3   :  { %710 = vmatpush.msra.mxu2 %v32_v0  ;;  %269 = vmatpush.msra.mxu3 %v832_v3  ;;  %v849_v6 = vld [vmem:[%s1012_s2 + $0x8] sm:$0xff]  ;;  %v857_v7 = vld [vmem:[%s1012_s2] sm:$0xff]  ;;  %v29_v39 = vld [vmem:[%s1011_s0 + $0x30] sm:$0xff] }
   0x4   :  { %711 = vmatpush.msra.mxu1 %v31_v1  ;;  %77 = vmatpush.msra.mxu0 %v31_v1  ;;  %v883_v11 = vld [vmem:[%s1013_s3] ss:$0 sm:$0xff]  ;;  %vm163_vm1 = vcmp.ge.s32.totalorder %v162_v20, 64  ;;  %vm164_vm2 = vcmp.lt.s32.totalorder %v162_v20, 96  ;;  %s783_s3 = smov 64   ;;  %v30_v40 = vld [vmem:[%s1011_s0 + $0x38] sm:$0xff] }
   0x5   :  { %690 = vmatmul.msk.f32.vlgmr.msra.gmra.mxu1 %vm37_vm0, %v28_v2  ;;  %685 = vmatmul.msk.f32.vlgmr.msra.gmra.mxu0 %vm37_vm0, %v23_v4  ;;  %vm886_vm5 = vmand %vm163_vm1, %vm164_vm2  ;;  %v24_v43 = vld [vmem:[%s1011_s0 + $0x8] sm:$0xff]  ;;  %v648_v27 = vld [vmem:[%s1014_s4 + $0x10] sm:$0xff] }
   0x6   :  { %132 = vmatpush.msrb.mxu1 %v832_v3  ;;  %712 = vmatpush.msra.mxu2 %v31_v1 }
   0x7   :  { %270 = vmatpush.msra.mxu3 %v842_v5  ;;  %691 = vmatmul.msk.f32.vlgmr.msra.gmra.mxu2 %vm37_vm0, %v29_v39 }
   0x8   :  { %203 = vmatpush.msrb.mxu2 %v832_v3  ;;  %133 = vmatpush.msrb.mxu1 %v842_v5 }
   0x9   :  { %271 = vmatpush.msra.mxu3 %v849_v6 }
   0xa   :  { %204 = vmatpush.msrb.mxu2 %v842_v5  ;;  %134 = vmatpush.msrb.mxu1 %v849_v6 }
   0xb   :  { %272 = vmatpush.msra.mxu3 %v857_v7 }
   0xc   :  { %205 = vmatpush.msrb.mxu2 %v849_v6  ;;  %135 = vmatpush.msrb.mxu1 %v857_v7 }
   0xd   :  { %467 = vmatpush.msrb.mxu3 %v832_v3  ;;  %136 = vmatmul.f32.vlgmr.msrb.gmra.mxu1 %v782_v8 }
   0xe   :  { %206 = vmatpush.msrb.mxu2 %v857_v7  ;;  %335 = vmatpush.msra.mxu1 %v832_v3 }
   0xf   :  { %468 = vmatpush.msrb.mxu3 %v842_v5  ;;  %692 = vmatmul.msk.f32.gmra.mxu2 %vm37_vm0, %v30_v40  ;;  %v26_v40 = vld [vmem:[%s1011_s0 + $0x18] sm:$0xff] }
  0x10   :  { %336 = vmatpush.msra.mxu1 %v842_v5  ;;  %401 = vmatpush.msra.mxu2 %v832_v3 }
  0x11   :  { %469 = vmatpush.msrb.mxu3 %v849_v6  ;;  %686 = vmatmul.msk.f32.gmra.mxu0 %vm37_vm0, %v24_v43 }
  0x12   :  { %337 = vmatpush.msra.mxu1 %v849_v6  ;;  %402 = vmatpush.msra.mxu2 %v842_v5 }
  0x13   :  { %470 = vmatpush.msrb.mxu3 %v857_v7 }
  0x14   :  { %338 = vmatpush.msra.mxu1 %v857_v7  ;;  %403 = vmatpush.msra.mxu2 %v849_v6 }
  0x16   :  { %533 = vmatpush.msrb.mxu1 %v832_v3  ;;  %404 = vmatpush.msra.mxu2 %v857_v7 }
  0x18   :  { %534 = vmatpush.msrb.mxu1 %v842_v5 }
  0x1a   :  { %535 = vmatpush.msrb.mxu1 %v849_v6 }
  0x1c   :  { %536 = vmatpush.msrb.mxu1 %v857_v7 }
  0x82   :  { %v878_v9 = vpop.f32.mrf.mxu1  ;;  %v79_v10 = vpop.f32.mrf.mxu0 }
  0x83   :  { %v80_v12 = vadd.f32 %v883_v11, %v79_v10 }
  0x8a   :  { %v137_v13 = vpop.f32.mrf.mxu1  ;;  %v917_v45 = vpop.f32.mrf.mxu2 }
  0x8b   :  { %v140_v14 = vadd.f32 %v137_v13, %v80_v12  ;;  %v25_v12 = vld [vmem:[%s1011_s0 + $0x10] sm:$0xff] }
  0x8c   :  { %687 = vmatmul.msk.f32.gmra.mxu0 %vm37_vm0, %v25_v12 }
  0x8d   :  { %v693_v15 = vmul.f32 -1.442695, %v140_v14 }
  0x8e   :  { %v82_v47 = vpop.f32.mrf.mxu0 }
  0x8f   :  { %718 = vpow2.f32 %v693_v15  ;;  %v83_v48 = vadd.f32 %v883_v11, %v82_v47 }
  0x92   :  { %v919_v46 = vpop.f32.mrf.mxu2 }
  0x94   :  { %688 = vmatmul.msk.f32.gmra.mxu0 %vm37_vm0, %v26_v40 }
  0x95   :  { %v719_v16 = vpop.eup %718 }
  0x96   :  { %v144_v17 = vadd.f32 1.0, %v719_v16 }
  0x98   :  { %720 = vrcp.f32 %v144_v17  ;;  %v156_v23 = vand.u32 2147483648, %v144_v17  ;;  %v154_v25 = vand.u32 2147483647, %v144_v17  ;;  %vm150_vm4 = vweird.f32 %v144_v17 }
  0x99   :  { %722 = vtanh.f32 %v140_v14 }
  0x9a   :  { %v157_v28 = vor.u32 1.1754944e-38, %v156_v23  ;;  %vm155_vm7 = vcmp.eq.f32.partialorder %v154_v25, 8.507059e+37 }
  0x9e   :  { %v721_v19 = vpop.eup %720 }
  0x9f   :  { %v146_v21 = vmul.f32 %v721_v19, %v144_v17  ;;  %vm151_vm3 = vweird.f32 %v721_v19  ;;  %v723_v30 = vpop.eup %722 }
  0xa0   :  { %vm152_vm6 = vmor %vm150_vm4, %vm151_vm3 }
  0xa1   :  { %v147_v22 = vsub.f32 1.0, %v146_v21 }
  0xa3   :  { %v148_v24 = vmul.f32 %v721_v19, %v147_v22 }
  0xa5   :  { %v149_v26 = vadd.f32 %v721_v19, %v148_v24 }
  0xa7   :  { %v153_v29 = vsel %vm152_vm6, %v721_v19, %v149_v26 }
  0xa8   :  { %v158_v31 = vsel %vm155_vm7, %v157_v28, %v153_v29 }
  0xa9   :  { %v166_v32 = vsel %vm886_vm5, %v723_v30, %v158_v31 }
  0xaa   :  { %169 = vrot.lane.b32.xlu0 %v166_v32, %s783_s3  ;;  %v167_v35 = vmul.f32 0.0, %v166_v32 }
 0x109   :  { %v85_v14 = vpop.f32.mrf.mxu0 }
 0x10a   :  { %v86_v15 = vadd.f32 %v883_v11, %v85_v14 }
 0x11c   :  { %v170_v33 = vpop.permute.xlu0 %169 }
 0x11d   :  { %v172_v34 = vmul.f32 %v170_v33, %v166_v32 }
 0x11f   :  { %174 = vrot.lane.b32.xlu0 %v172_v34, %s784_s13 }
 0x191   :  { %v175_v36 = vpop.permute.xlu0 %174 }
 0x192   :  { %v177_v37 = vadd.f32 %v175_v36, %v167_v35 }
 0x194   :  { %724 = vtanh.f32 %v177_v37 }
 0x19a   :  { %v725_v38 = vpop.eup %724 }
 0x19b   :  { %180 = vrot.lane.b32.xlu1 %v725_v38, %s783_s3 }
 0x20d   :  { %v181_v41 = vpop.permute.xlu1 %180 }
 0x20e   :  { %v183_v42 = vmul.f32 %v181_v41, %v166_v32 }
 0x210   :  { %187 = vrot.lane.b32.xlu1 %v183_v42, %s784_s13 }
 0x282   :  { %v188_v44 = vpop.permute.xlu1 %187 }
 0x283   :  { %694 = vmatmul.msk.f32.vlgmr.msrb.gmra.mxu2 %vm116_vm8, %v188_v44  ;;  %v88_v44 = vpop.f32.mrf.mxu0 }
 0x284   :  { %599 = vmatpush.msrb.mxu2 %v832_v3  ;;  %v89_v47 = vadd.f32 %v883_v11, %v88_v44 }
 0x286   :  { %600 = vmatpush.msrb.mxu2 %v842_v5 }
 0x288   :  { %601 = vmatpush.msrb.mxu2 %v849_v6 }
 0x28a   :  { %602 = vmatpush.msrb.mxu2 %v857_v7 }
 0x306   :  { %v208_v49 = vpop.f32.mrf.mxu2 }
 0x307   :  { %v211_v50 = vadd.f32 %v208_v49, %v83_v48 }
 0x309   :  { %v695_v51 = vmul.f32 -1.442695, %v211_v50 }
 0x30b   :  { %726 = vpow2.f32 %v695_v51 }
 0x311   :  { %v727_v52 = vpop.eup %726 }
 0x312   :  { %v215_v53 = vadd.f32 1.0, %v727_v52 }
 0x314   :  { %728 = vrcp.f32 %v215_v53  ;;  %v227_v57 = vand.u32 2147483648, %v215_v53  ;;  %v225_v59 = vand.u32 2147483647, %v215_v53  ;;  %vm221_vm10 = vweird.f32 %v215_v53 }
 0x315   :  { %730 = vtanh.f32 %v211_v50 }
 0x316   :  { %v228_v61 = vor.u32 1.1754944e-38, %v227_v57  ;;  %vm226_vm12 = vcmp.eq.f32.partialorder %v225_v59, 8.507059e+37 }
 0x31a   :  { %v729_v54 = vpop.eup %728 }
 0x31b   :  { %v217_v55 = vmul.f32 %v729_v54, %v215_v53  ;;  %vm222_vm9 = vweird.f32 %v729_v54  ;;  %v731_v63 = vpop.eup %730 }
 0x31c   :  { %vm223_vm11 = vmor %vm221_vm10, %vm222_vm9 }
 0x31d   :  { %v218_v56 = vsub.f32 1.0, %v217_v55 }
 0x31f   :  { %v219_v58 = vmul.f32 %v729_v54, %v218_v56 }
 0x321   :  { %v220_v60 = vadd.f32 %v729_v54, %v219_v58 }
 0x323   :  { %v224_v62 = vsel %vm223_vm11, %v729_v54, %v220_v60 }
 0x324   :  { %v229_v0 = vsel %vm226_vm12, %v228_v61, %v224_v62 }
 0x325   :  { %v232_v1 = vsel %vm886_vm5, %v731_v63, %v229_v0 }
 0x326   :  { %235 = vrot.lane.b32.xlu2 %v232_v1, %s783_s3  ;;  %v233_v4 = vmul.f32 %v232_v1, %v177_v37 }
 0x380   :  { %v236_v2 = vpop.permute.xlu2 %235 }
 0x381   :  { %v238_v3 = vmul.f32 %v236_v2, %v232_v1 }
 0x383   :  { %240 = vrot.lane.b32.xlu2 %v238_v3, %s784_s13 }
 0x3dd   :  { %v241_v5 = vpop.permute.xlu2 %240 }
 0x3de   :  { %v243_v6 = vadd.f32 %v241_v5, %v233_v4 }
 0x3e0   :  { %732 = vtanh.f32 %v243_v6 }
 0x3e6   :  { %v733_v7 = vpop.eup %732 }
 0x3e7   :  { %246 = vrot.lane.b32.xlu0 %v733_v7, %s783_s3 }
 0x459   :  { %v247_v8 = vpop.permute.xlu0 %246 }
 0x45a   :  { %v249_v10 = vmul.f32 %v247_v8, %v232_v1 }
 0x45c   :  { %253 = vrot.lane.b32.xlu1 %v249_v10, %s784_s13  ;;  %v27_v10 = vld [vmem:[%s1011_s0 + $0x20] sm:$0xff] }
 0x45d   :  { %689 = vmatmul.msk.f32.gmra.mxu0 %vm37_vm0, %v27_v10 }
 0x4ce   :  { %v254_v13 = vpop.permute.xlu1 %253 }
 0x4cf   :  { %696 = vmatmul.msk.f32.vlgmr.msra.gmra.mxu3 %vm116_vm8, %v254_v13 }
 0x4da   :  { %v91_v13 = vpop.f32.mrf.mxu0 }
 0x4db   :  { %v92_v14 = vadd.f32 %v883_v11, %v91_v13 }
 0x552   :  { %v274_v16 = vpop.f32.mrf.mxu3 }
 0x553   :  { %v277_v17 = vadd.f32 %v274_v16, %v86_v15 }
 0x555   :  { %v697_v18 = vmul.f32 -1.442695, %v277_v17 }
 0x557   :  { %734 = vpow2.f32 %v697_v18 }
 0x55d   :  { %v735_v19 = vpop.eup %734 }
 0x55e   :  { %v281_v20 = vadd.f32 1.0, %v735_v19 }
 0x560   :  { %736 = vrcp.f32 %v281_v20  ;;  %v293_v24 = vand.u32 2147483648, %v281_v20  ;;  %v291_v26 = vand.u32 2147483647, %v281_v20  ;;  %vm287_vm14 = vweird.f32 %v281_v20 }
 0x561   :  { %738 = vtanh.f32 %v277_v17 }
 0x562   :  { %v294_v29 = vor.u32 1.1754944e-38, %v293_v24  ;;  %vm292_vm1 = vcmp.eq.f32.partialorder %v291_v26, 8.507059e+37 }
 0x566   :  { %v737_v21 = vpop.eup %736 }
 0x567   :  { %v283_v22 = vmul.f32 %v737_v21, %v281_v20  ;;  %vm288_vm13 = vweird.f32 %v737_v21  ;;  %v739_v31 = vpop.eup %738 }
 0x568   :  { %vm289_vm15 = vmor %vm287_vm14, %vm288_vm13 }
 0x569   :  { %v284_v23 = vsub.f32 1.0, %v283_v22 }
 0x56b   :  { %v285_v25 = vmul.f32 %v737_v21, %v284_v23 }
 0x56d   :  { %v286_v28 = vadd.f32 %v737_v21, %v285_v25 }
 0x56f   :  { %v290_v30 = vsel %vm289_vm15, %v737_v21, %v286_v28 }
 0x570   :  { %v295_v32 = vsel %vm292_vm1, %v294_v29, %v290_v30 }
 0x571   :  { %v298_v33 = vsel %vm886_vm5, %v739_v31, %v295_v32 }
 0x572   :  { %301 = vrot.lane.b32.xlu2 %v298_v33, %s783_s3  ;;  %v299_v36 = vmul.f32 %v298_v33, %v243_v6 }
 0x5cc   :  { %v302_v34 = vpop.permute.xlu2 %301 }
 0x5cd   :  { %v304_v35 = vmul.f32 %v302_v34, %v298_v33 }
 0x5cf   :  { %306 = vrot.lane.b32.xlu0 %v304_v35, %s784_s13 }
 0x641   :  { %v307_v37 = vpop.permute.xlu0 %306 }
 0x642   :  { %v309_v38 = vadd.f32 %v307_v37, %v299_v36 }
 0x644   :  { %740 = vtanh.f32 %v309_v38 }
 0x64a   :  { %v741_v39 = vpop.eup %740 }
 0x64b   :  { %312 = vrot.lane.b32.xlu1 %v741_v39, %s783_s3 }
 0x6bd   :  { %v313_v41 = vpop.permute.xlu1 %312 }
 0x6be   :  { %v315_v42 = vmul.f32 %v313_v41, %v298_v33 }
 0x6c0   :  { %319 = vrot.lane.b32.xlu2 %v315_v42, %s784_s13  ;;  %v95_v42 = vadd.f32 %v883_v11, %v878_v9 }
 0x71a   :  { %v320_v43 = vpop.permute.xlu2 %319 }
 0x71b   :  { %698 = vmatmul.msk.f32.vlgmr.msra.gmra.mxu1 %vm116_vm8, %v320_v43 }
 0x798   :  { %v340_v48 = vpop.f32.mrf.mxu1 }
 0x799   :  { %v343_v49 = vadd.f32 %v340_v48, %v89_v47 }
 0x79b   :  { %v699_v50 = vmul.f32 -1.442695, %v343_v49 }
 0x79d   :  { %742 = vpow2.f32 %v699_v50 }
 0x7a3   :  { %v743_v51 = vpop.eup %742 }
 0x7a4   :  { %v347_v52 = vadd.f32 1.0, %v743_v51 }
 0x7a6   :  { %744 = vrcp.f32 %v347_v52  ;;  %v359_v56 = vand.u32 2147483648, %v347_v52  ;;  %v357_v58 = vand.u32 2147483647, %v347_v52  ;;  %vm353_vm3 = vweird.f32 %v347_v52 }
 0x7a7   :  { %746 = vtanh.f32 %v343_v49 }
 0x7a8   :  { %v360_v60 = vor.u32 1.1754944e-38, %v359_v56  ;;  %vm358_vm6 = vcmp.eq.f32.partialorder %v357_v58, 8.507059e+37 }
 0x7ac   :  { %v745_v53 = vpop.eup %744 }
 0x7ad   :  { %v349_v54 = vmul.f32 %v745_v53, %v347_v52  ;;  %vm354_vm2 = vweird.f32 %v745_v53  ;;  %v747_v62 = vpop.eup %746 }
 0x7ae   :  { %vm355_vm4 = vmor %vm353_vm3, %vm354_vm2 }
 0x7af   :  { %v350_v55 = vsub.f32 1.0, %v349_v54 }
 0x7b1   :  { %v351_v57 = vmul.f32 %v745_v53, %v350_v55 }
 0x7b3   :  { %v352_v59 = vadd.f32 %v745_v53, %v351_v57 }
 0x7b5   :  { %v356_v61 = vsel %vm355_vm4, %v745_v53, %v352_v59 }
 0x7b6   :  { %v361_v63 = vsel %vm358_vm6, %v360_v60, %v356_v61 }
 0x7b7   :  { %v364_v0 = vsel %vm886_vm5, %v747_v62, %v361_v63 }
 0x7b8   :  { %367 = vrot.lane.b32.xlu0 %v364_v0, %s783_s3  ;;  %v365_v3 = vmul.f32 %v364_v0, %v309_v38 }
 0x82a   :  { %v368_v1 = vpop.permute.xlu0 %367 }
 0x82b   :  { %v370_v2 = vmul.f32 %v368_v1, %v364_v0 }
 0x82d   :  { %372 = vrot.lane.b32.xlu1 %v370_v2, %s784_s13 }
 0x89f   :  { %v373_v4 = vpop.permute.xlu1 %372 }
 0x8a0   :  { %v375_v5 = vadd.f32 %v373_v4, %v365_v3 }
 0x8a2   :  { %748 = vtanh.f32 %v375_v5 }
 0x8a8   :  { %v749_v6 = vpop.eup %748 }
 0x8a9   :  { %378 = vrot.lane.b32.xlu2 %v749_v6, %s783_s3  ;;  %v98_v6 = vadd.f32 %v883_v11, %v917_v45 }
 0x903   :  { %v379_v7 = vpop.permute.xlu2 %378 }
 0x904   :  { %v381_v8 = vmul.f32 %v379_v7, %v364_v0 }
 0x906   :  { %385 = vrot.lane.b32.xlu0 %v381_v8, %s784_s13 }
 0x978   :  { %v386_v12 = vpop.permute.xlu0 %385 }
 0x979   :  { %700 = vmatmul.msk.f32.vlgmr.msra.gmra.mxu2 %vm116_vm8, %v386_v12 }
 0x9fc   :  { %v406_v15 = vpop.f32.mrf.mxu2 }
 0x9fd   :  { %v409_v16 = vadd.f32 %v406_v15, %v92_v14 }
 0x9ff   :  { %v701_v17 = vmul.f32 -1.442695, %v409_v16 }
 0xa01   :  { %750 = vpow2.f32 %v701_v17 }
 0xa07   :  { %v751_v18 = vpop.eup %750 }
 0xa08   :  { %v413_v19 = vadd.f32 1.0, %v751_v18 }
 0xa0a   :  { %752 = vrcp.f32 %v413_v19  ;;  %v425_v23 = vand.u32 2147483648, %v413_v19  ;;  %v423_v25 = vand.u32 2147483647, %v413_v19  ;;  %vm419_vm7 = vweird.f32 %v413_v19 }
 0xa0b   :  { %754 = vtanh.f32 %v409_v16 }
 0xa0c   :  { %v426_v28 = vor.u32 1.1754944e-38, %v425_v23  ;;  %vm424_vm10 = vcmp.eq.f32.partialorder %v423_v25, 8.507059e+37 }
 0xa10   :  { %v753_v20 = vpop.eup %752 }
 0xa11   :  { %v415_v21 = vmul.f32 %v753_v20, %v413_v19  ;;  %vm420_vm0 = vweird.f32 %v753_v20  ;;  %v755_v30 = vpop.eup %754 }
 0xa12   :  { %vm421_vm9 = vmor %vm419_vm7, %vm420_vm0 }
 0xa13   :  { %v416_v22 = vsub.f32 1.0, %v415_v21 }
 0xa15   :  { %v417_v24 = vmul.f32 %v753_v20, %v416_v22 }
 0xa17   :  { %v418_v26 = vadd.f32 %v753_v20, %v417_v24 }
 0xa19   :  { %v422_v29 = vsel %vm421_vm9, %v753_v20, %v418_v26 }
 0xa1a   :  { %v427_v31 = vsel %vm424_vm10, %v426_v28, %v422_v29 }
 0xa1b   :  { %v430_v32 = vsel %vm886_vm5, %v755_v30, %v427_v31 }
 0xa1c   :  { %433 = vrot.lane.b32.xlu1 %v430_v32, %s783_s3  ;;  %v431_v35 = vmul.f32 %v430_v32, %v375_v5 }
 0xa8e   :  { %v434_v33 = vpop.permute.xlu1 %433 }
 0xa8f   :  { %v436_v34 = vmul.f32 %v434_v33, %v430_v32 }
 0xa91   :  { %438 = vrot.lane.b32.xlu2 %v436_v34, %s784_s13 }
 0xaeb   :  { %v439_v36 = vpop.permute.xlu2 %438 }
 0xaec   :  { %v441_v37 = vadd.f32 %v439_v36, %v431_v35  ;;  %v101_v35 = vadd.f32 %v883_v11, %v919_v46 }
 0xaee   :  { %756 = vtanh.f32 %v441_v37 }
 0xaf4   :  { %v757_v38 = vpop.eup %756 }
 0xaf5   :  { %444 = vrot.lane.b32.xlu0 %v757_v38, %s783_s3 }
 0xb67   :  { %v445_v39 = vpop.permute.xlu0 %444 }
 0xb68   :  { %v447_v40 = vmul.f32 %v445_v39, %v430_v32 }
 0xb6a   :  { %451 = vrot.lane.b32.xlu1 %v447_v40, %s784_s13 }
 0xbdc   :  { %v452_v41 = vpop.permute.xlu1 %451 }
 0xbdd   :  { %702 = vmatmul.msk.f32.vlgmr.msrb.gmra.mxu3 %vm116_vm8, %v452_v41 }
 0xc60   :  { %v472_v43 = vpop.f32.mrf.mxu3 }
 0xc61   :  { %v475_v44 = vadd.f32 %v472_v43, %v95_v42 }
 0xc63   :  { %v703_v47 = vmul.f32 -1.442695, %v475_v44 }
 0xc65   :  { %758 = vpow2.f32 %v703_v47 }
 0xc6b   :  { %v759_v48 = vpop.eup %758 }
 0xc6c   :  { %v479_v49 = vadd.f32 1.0, %v759_v48 }
 0xc6e   :  { %760 = vrcp.f32 %v479_v49  ;;  %v491_v53 = vand.u32 2147483648, %v479_v49  ;;  %v489_v55 = vand.u32 2147483647, %v479_v49  ;;  %vm485_vm12 = vweird.f32 %v479_v49 }
 0xc6f   :  { %762 = vtanh.f32 %v475_v44 }
 0xc70   :  { %v492_v57 = vor.u32 1.1754944e-38, %v491_v53  ;;  %vm490_vm14 = vcmp.eq.f32.partialorder %v489_v55, 8.507059e+37 }
 0xc74   :  { %v761_v50 = vpop.eup %760 }
 0xc75   :  { %v481_v51 = vmul.f32 %v761_v50, %v479_v49  ;;  %vm486_vm11 = vweird.f32 %v761_v50  ;;  %v763_v58 = vpop.eup %762 }
 0xc76   :  { %vm487_vm13 = vmor %vm485_vm12, %vm486_vm11 }
 0xc77   :  { %v482_v52 = vsub.f32 1.0, %v481_v51 }
 0xc79   :  { %v483_v54 = vmul.f32 %v761_v50, %v482_v52 }
 0xc7b   :  { %v484_v56 = vadd.f32 %v761_v50, %v483_v54 }
 0xc7d   :  { %v488_v9 = vsel %vm487_vm13, %v761_v50, %v484_v56 }
 0xc7e   :  { %v493_v59 = vsel %vm490_vm14, %v492_v57, %v488_v9 }
 0xc7f   :  { %v496_v60 = vsel %vm886_vm5, %v763_v58, %v493_v59  ;;  %v649_v58 = vld [vmem:[%s1014_s4 + $0x18] sm:$0xff]  ;;  %v647_v59 = vld [vmem:[%s1014_s4 + $0x8] sm:$0xff] }
 0xc80   :  { %499 = vrot.lane.b32.xlu2 %v496_v60, %s783_s3  ;;  %v497_v63 = vmul.f32 %v496_v60, %v441_v37  ;;  %671 = vmatpush.msra.mxu3 %v649_v58 }
 0xc82   :  { %672 = vmatpush.msra.mxu3 %v648_v27 }
 0xc84   :  { %673 = vmatpush.msra.mxu3 %v647_v59 }
 0xcda   :  { %v500_v61 = vpop.permute.xlu2 %499 }
 0xcdb   :  { %v502_v62 = vmul.f32 %v500_v61, %v496_v60 }
 0xcdd   :  { %504 = vrot.lane.b32.xlu0 %v502_v62, %s784_s13 }
 0xd4f   :  { %v505_v0 = vpop.permute.xlu0 %504 }
 0xd50   :  { %v507_v1 = vadd.f32 %v505_v0, %v497_v63  ;;  %v717_v0 = vld [vmem:[%s1015_s5] ss:$0 sm:$0xff] }
 0xd52   :  { %764 = vtanh.f32 %v507_v1 }
 0xd58   :  { %v765_v2 = vpop.eup %764 }
 0xd59   :  { %510 = vrot.lane.b32.xlu1 %v765_v2, %s783_s3 }
 0xdcb   :  { %v511_v3 = vpop.permute.xlu1 %510 }
 0xdcc   :  { %v513_v4 = vmul.f32 %v511_v3, %v496_v60  ;;  %v646_v60 = vld [vmem:[%s1014_s4] sm:$0xff] }
 0xdcd   :  { %674 = vmatpush.msra.mxu3 %v646_v60 }
 0xdce   :  { %517 = vrot.lane.b32.xlu2 %v513_v4, %s784_s13 }
 0xe28   :  { %v518_v5 = vpop.permute.xlu2 %517 }
 0xe29   :  { %704 = vmatmul.msk.f32.vlgmr.msrb.gmra.mxu1 %vm116_vm8, %v518_v5 }
 0xea6   :  { %v538_v7 = vpop.f32.mrf.mxu1 }
 0xea7   :  { %v541_v8 = vadd.f32 %v538_v7, %v98_v6 }
 0xea9   :  { %v705_v10 = vmul.f32 -1.442695, %v541_v8 }
 0xeab   :  { %766 = vpow2.f32 %v705_v10 }
 0xeb1   :  { %v767_v12 = vpop.eup %766 }
 0xeb2   :  { %v545_v13 = vadd.f32 1.0, %v767_v12 }
 0xeb4   :  { %768 = vrcp.f32 %v545_v13  ;;  %v557_v17 = vand.u32 2147483648, %v545_v13  ;;  %v555_v19 = vand.u32 2147483647, %v545_v13  ;;  %vm551_vm1 = vweird.f32 %v545_v13 }
 0xeb5   :  { %770 = vtanh.f32 %v541_v8 }
 0xeb6   :  { %v558_v21 = vor.u32 1.1754944e-38, %v557_v17  ;;  %vm556_vm3 = vcmp.eq.f32.partialorder %v555_v19, 8.507059e+37 }
 0xeba   :  { %v769_v14 = vpop.eup %768 }
 0xebb   :  { %v547_v15 = vmul.f32 %v769_v14, %v545_v13  ;;  %vm552_vm15 = vweird.f32 %v769_v14  ;;  %v771_v22 = vpop.eup %770 }
 0xebc   :  { %vm553_vm2 = vmor %vm551_vm1, %vm552_vm15 }
 0xebd   :  { %v548_v16 = vsub.f32 1.0, %v547_v15 }
 0xebf   :  { %v549_v18 = vmul.f32 %v769_v14, %v548_v16 }
 0xec1   :  { %v550_v20 = vadd.f32 %v769_v14, %v549_v18 }
 0xec3   :  { %v554_v45 = vsel %vm553_vm2, %v769_v14, %v550_v20 }
 0xec4   :  { %v559_v23 = vsel %vm556_vm3, %v558_v21, %v554_v45 }
 0xec5   :  { %v562_v24 = vsel %vm886_vm5, %v771_v22, %v559_v23 }
 0xec6   :  { %565 = vrot.lane.b32.xlu0 %v562_v24, %s783_s3  ;;  %v563_v28 = vmul.f32 %v562_v24, %v507_v1 }
 0xf38   :  { %v566_v25 = vpop.permute.xlu0 %565 }
 0xf39   :  { %v568_v26 = vmul.f32 %v566_v25, %v562_v24 }
 0xf3b   :  { %570 = vrot.lane.b32.xlu1 %v568_v26, %s784_s13 }
 0xfad   :  { %v571_v29 = vpop.permute.xlu1 %570 }
 0xfae   :  { %v573_v30 = vadd.f32 %v571_v29, %v563_v28 }
 0xfb0   :  { %772 = vtanh.f32 %v573_v30 }
 0xfb6   :  { %v773_v31 = vpop.eup %772 }
 0xfb7   :  { %576 = vrot.lane.b32.xlu2 %v773_v31, %s783_s3 }
0x1011   :  { %v577_v32 = vpop.permute.xlu2 %576 }
0x1012   :  { %v579_v33 = vmul.f32 %v577_v32, %v562_v24 }
0x1014   :  { %583 = vrot.lane.b32.xlu0 %v579_v33, %s784_s13 }
0x1086   :  { %v584_v34 = vpop.permute.xlu0 %583 }
0x1087   :  { %706 = vmatmul.msk.f32.vlgmr.msrb.gmra.mxu2 %vm116_vm8, %v584_v34 }
0x110a   :  { %v604_v36 = vpop.f32.mrf.mxu2 }
0x110b   :  { %v607_v37 = vadd.f32 %v604_v36, %v101_v35 }
0x110d   :  { %v707_v38 = vmul.f32 -1.442695, %v607_v37 }
0x110f   :  { %774 = vpow2.f32 %v707_v38 }
0x1115   :  { %v775_v39 = vpop.eup %774 }
0x1116   :  { %v611_v40 = vadd.f32 1.0, %v775_v39 }
0x1118   :  { %776 = vrcp.f32 %v611_v40  ;;  %v623_v44 = vand.u32 2147483648, %v611_v40  ;;  %v621_v48 = vand.u32 2147483647, %v611_v40  ;;  %vm617_vm6 = vweird.f32 %v611_v40 }
0x1119   :  { %778 = vtanh.f32 %v607_v37 }
0x111a   :  { %v624_v50 = vor.u32 1.1754944e-38, %v623_v44  ;;  %vm622_vm7 = vcmp.eq.f32.partialorder %v621_v48, 8.507059e+37 }
0x111e   :  { %v777_v41 = vpop.eup %776 }
0x111f   :  { %v613_v42 = vmul.f32 %v777_v41, %v611_v40  ;;  %vm618_vm4 = vweird.f32 %v777_v41  ;;  %v779_v46 = vpop.eup %778 }
0x1120   :  { %vm619_vm0 = vmor %vm617_vm6, %vm618_vm4 }
0x1121   :  { %v614_v43 = vsub.f32 1.0, %v613_v42 }
0x1123   :  { %v615_v47 = vmul.f32 %v777_v41, %v614_v43 }
0x1125   :  { %v616_v49 = vadd.f32 %v777_v41, %v615_v47 }
0x1127   :  { %v620_v11 = vsel %vm619_vm0, %v777_v41, %v616_v49 }
0x1128   :  { %v625_v51 = vsel %vm622_vm7, %v624_v50, %v620_v11 }
0x1129   :  { %v628_v52 = vsel %vm886_vm5, %v779_v46, %v625_v51  ;;  %vm679_vm5 = vcmask 23552  }
0x112a   :  { %631 = vrot.lane.b32.xlu1 %v628_v52, %s783_s3  ;;  %v629_v55 = vmul.f32 %v628_v52, %v573_v30 }
0x119c   :  { %v632_v53 = vpop.permute.xlu1 %631 }
0x119d   :  { %v634_v54 = vmul.f32 %v632_v53, %v628_v52 }
0x119f   :  { %636 = vrot.lane.b32.xlu2 %v634_v54, %s784_s13 }
0x11f9   :  { %v637_v56 = vpop.permute.xlu2 %636 }
0x11fa   :  { %v639_v57 = vadd.f32 %v637_v56, %v629_v55 }
0x11fc   :  { %780 = vtanh.f32 %v639_v57 }
0x1202   :  { %v781_v9 = vpop.eup %780 }
0x1203   :  { %642 = vrot.lane.b32.xlu0 %v781_v9, %s783_s3 }
0x1275   :  { %v643_v61 = vpop.permute.xlu0 %642 }
0x1276   :  { %v645_v62 = vmul.f32 %v643_v61, %v628_v52 }
0x1278   :  { %655 = vrot.lane.b32.xlu1 %v645_v62, %s784_s13 }
0x12ea   :  { %v656_v63 = vpop.permute.xlu1 %655 }
0x12eb   :  { %708 = vmatmul.msk.f32.vlgmr.msra.gmra.mxu3 %vm116_vm8, %v656_v63 }
0x136e   :  { %v676_v1 = vpop.f32.mrf.mxu3 }
0x136f   :  { %v677_v2 = vadd.f32 %v717_v0, %v676_v1 }
0x1371   :  { %680 = vst.msk [vmem:[%s1016_s6] sm:$0xff] %vm679_vm5, %v677_v2 }

</bundles_post_ra>
